<compile_context>
chip_gen: v7x
topology: tpu7x:2x2x1
jax: 0.10.0
libtpu: 0.0.40
codegen_flags: <defaults>
</compile_context>

<pallas_src>
import jax
import jax.numpy as jnp
from jax.experimental import pallas as pl
from jax.experimental.pallas import tpu as pltpu

D_SEED, D_LABEL = 100, 10
D_IN = D_SEED + D_LABEL          # 110
P_IN = 128                       # lane-padded concat width (110 -> 128)
D_HID = 200
P_HID = 256                      # lane-padded hidden width
D_OUT = 784                      # output kept un-padded (block dim == full dim)
LN_EPS = 1e-5
LEAK = 0.02
TILE_B_MAX = 1024                # amortizes ~0.35 us/step pipeline overhead


def _round_up(x, m):
    return (x + m - 1) // m * m


def _choose_tile_b(B):
    """Batch tile: large (amortize per-step overhead), >= 2 grid steps when
    possible (v7x megacore), MXU-friendly rounding for big tiles."""
    tb = _round_up(max(B, 1), 8)             # f32 sublane multiple
    if tb > 8:
        tb = _round_up((tb + 1) // 2, 8)     # aim for a grid of >= 2 steps
    tb = min(tb, TILE_B_MAX)
    if tb > 128:
        tb = min(_round_up(tb, 128), TILE_B_MAX)   # keep the MXU M dim full
    return tb


def generator_kernel(x_ref, w1_ref, aff_ref, w2_ref, b2_ref, o_ref):
    # ---- Linear(110, 200): single fused K=128 dot (concat folded in wrapper) ----
    aff = aff_ref[...]                                   # (3, 256): b1 / gamma / beta
    h = (jnp.dot(x_ref[...].astype(jnp.bfloat16), w1_ref[...],
                 preferred_element_type=jnp.float32)
         + aff[0:1, :])                                  # (tb, 256); pad lanes are exactly 0

    # ---- LayerNorm(200): no lane mask needed (pad lanes of h are 0);
    #      true /200 denominator, var via E[h^2] - mean^2 ----
    inv_d = jnp.float32(1.0 / D_HID)
    mean = jnp.sum(h, axis=-1, keepdims=True) * inv_d
    var = jnp.sum(h * h, axis=-1, keepdims=True) * inv_d - mean * mean
    hn = (h - mean) * jax.lax.rsqrt(var + LN_EPS)
    hn = hn * aff[1:2, :] + aff[2:3, :]                  # padded gamma/beta = 0

    # ---- LeakyReLU(0.02) ----
    a = jnp.maximum(hn, LEAK * hn)

    # ---- Linear(200, 784) + exact sigmoid (guaranteed [0, 1]) ----
    y = jnp.dot(a.astype(jnp.bfloat16), w2_ref[...],
                preferred_element_type=jnp.float32) + b2_ref[...]
    o_ref[...] = 1.0 / (1.0 + jnp.exp(-y))


def init_params(key):
    """PyTorch-default init: U(-1/sqrt(fan_in), 1/sqrt(fan_in)); LN affine = (1, 0)."""
    k1, k2, k3, k4 = jax.random.split(key, 4)
    lim1 = 1.0 / jnp.sqrt(jnp.float32(D_IN))
    lim2 = 1.0 / jnp.sqrt(jnp.float32(D_HID))
    w1 = jax.random.uniform(k1, (D_IN, D_HID), jnp.float32, -lim1, lim1)
    b1 = jax.random.uniform(k2, (D_HID,), jnp.float32, -lim1, lim1)
    gamma = jnp.ones((D_HID,), jnp.float32)
    beta = jnp.zeros((D_HID,), jnp.float32)
    w2 = jax.random.uniform(k3, (D_HID, D_OUT), jnp.float32, -lim2, lim2)
    b2 = jax.random.uniform(k4, (D_OUT,), jnp.float32, -lim2, lim2)
    return (w1, b1, gamma, beta, w2, b2)


def pack_params(params):
    """Zero-pad to lane multiples, fuse W1 blocks, cast matmul weights to bf16."""
    w1, b1, gamma, beta, w2, b2 = params
    w1p = jnp.zeros((P_IN, P_HID), jnp.float32).at[:D_IN, :D_HID].set(w1)
    aff = (jnp.zeros((3, P_HID), jnp.float32)
           .at[0, :D_HID].set(b1)
           .at[1, :D_HID].set(gamma)
           .at[2, :D_HID].set(beta))
    w2p = jnp.zeros((P_HID, D_OUT), jnp.float32).at[:D_HID, :].set(w2)
    b2p = b2[None, :]
    return (w1p.astype(jnp.bfloat16), aff, w2p.astype(jnp.bfloat16), b2p)


@jax.jit
def generator_forward(seed_tensor, label_tensor, packed):
    """Batched (B,100)+(B,10) -> (B,784); also accepts 1-D inputs like the PyTorch forward."""
    squeeze = seed_tensor.ndim == 1
    if squeeze:
        seed_tensor = seed_tensor[None, :]
        label_tensor = label_tensor[None, :]
    B = seed_tensor.shape[0]

    tb = _choose_tile_b(B)
    Bp = _round_up(B, tb)

    # Fold torch.cat into a single lane-padded (Bp, 128) input slab.
    x = jnp.concatenate([seed_tensor.astype(jnp.float32),
                         label_tensor.astype(jnp.float32)], axis=-1)
    x = jnp.pad(x, ((0, Bp - B), (0, P_IN - D_IN)))

    w1p, aff, w2p, b2p = packed
    resident = lambda shape: pl.BlockSpec(shape, lambda i: (0, 0))

    out = pl.pallas_call(
        generator_kernel,
        out_shape=jax.ShapeDtypeStruct((Bp, D_OUT), jnp.float32),
        grid=(Bp // tb,),
        in_specs=[
            pl.BlockSpec((tb, P_IN), lambda i: (i, 0)),   # concat(seed,label), batch-tiled
            resident((P_IN, P_HID)),                       # W1 (bf16), VMEM-resident
            resident((3, P_HID)),                          # b1 / gamma / beta
            resident((P_HID, D_OUT)),                      # W2 (bf16)
            resident((1, D_OUT)),                          # b2
        ],
        out_specs=pl.BlockSpec((tb, D_OUT), lambda i: (i, 0)),
        compiler_params=pltpu.CompilerParams(
            dimension_semantics=("parallel",),
            vmem_limit_bytes=48 * 1024 * 1024),
    )(x, w1p, aff, w2p, b2p)

    if Bp != B:
        out = out[:B]
    return out[0] if squeeze else out


def reference_forward(seed, label, packed):
    """Pure-JAX reference mirroring the kernel math (bf16 matmuls, f32 accumulate)."""
    w1p, aff, w2p, b2p = packed
    x = jnp.concatenate([seed, label], axis=-1)
    x = jnp.pad(x, ((0, 0), (0, P_IN - D_IN)))
    h = jnp.dot(x.astype(jnp.bfloat16), w1p,
                preferred_element_type=jnp.float32) + aff[0:1]
    mean = jnp.sum(h, axis=-1, keepdims=True) / D_HID
    var = jnp.sum(h * h, axis=-1, keepdims=True) / D_HID - mean * mean
    hn = (h - mean) * jax.lax.rsqrt(var + LN_EPS) * aff[1:2] + aff[2:3]
    a = jnp.maximum(hn, LEAK * hn)
    y = jnp.dot(a.astype(jnp.bfloat16), w2p,
                preferred_element_type=jnp.float32) + b2p
    return jax.nn.sigmoid(y)


if __name__ == "__main__":
    key = jax.random.PRNGKey(0)
    kp, ks, kl = jax.random.split(key, 3)

    params = init_params(kp)
    packed = pack_params(params)

    # Batched inputs; B=64 -> tb=32, grid=(2,) exercises the multi-step path.
    B = 64
    seed_tensor = jax.random.normal(ks, (B, D_SEED), jnp.float32)
    labels = jax.random.randint(kl, (B,), 0, 10)
    label_tensor = jax.nn.one_hot(labels, D_LABEL).astype(jnp.float32)

    out = jax.block_until_ready(generator_forward(seed_tensor, label_tensor, packed))

    # Unbatched path matching the PyTorch forward signature (1-D seed / label).
    out1 = jax.block_until_ready(
        generator_forward(seed_tensor[0], label_tensor[0], packed))

    ref = jax.block_until_ready(reference_forward(seed_tensor, label_tensor, packed))

    assert out.shape == (B, D_OUT)
    assert out1.shape == (D_OUT,)
    assert bool(jnp.all(jnp.isfinite(out)))
    assert bool(jnp.all((out >= 0.0) & (out <= 1.0)))                # exact sigmoid range
    assert bool(jnp.allclose(out, ref, atol=1e-2, rtol=0.0))         # bf16-matmul tolerance
    assert bool(jnp.allclose(out1, out[0], atol=1e-5, rtol=0.0))     # batched == unbatched
    print("KERNEL_OK")
</pallas_src>

<mosaic_0001>
module attributes {stable_mosaic.version = 11 : i64} {
  func.func @generator_kernel(%arg0: i32, %arg1: memref<32x128xf32, #tpu.memory_space<vmem>>, %arg2: memref<128x256xbf16, #tpu.memory_space<vmem>>, %arg3: memref<3x256xf32, #tpu.memory_space<vmem>>, %arg4: memref<256x784xbf16, #tpu.memory_space<vmem>>, %arg5: memref<1x784xf32, #tpu.memory_space<vmem>>, %arg6: memref<32x784xf32, #tpu.memory_space<vmem>>) attributes {dimension_semantics = [#tpu.dimension_semantics<parallel>], iteration_bounds = array<i64: 2>, scalar_prefetch = 0 : i64, scratch_operands = 0 : i64, tpu.core_type = #tpu.core_type<tc>, window_params = [{transform_indices = @transform_0, window_bounds = array<i64: 32, 128>}, {pipeline_mode = #tpu.pipeline_mode<synchronous>, transform_indices = @transform_1, window_bounds = array<i64: 128, 256>}, {pipeline_mode = #tpu.pipeline_mode<synchronous>, transform_indices = @transform_2, window_bounds = array<i64: 3, 256>}, {pipeline_mode = #tpu.pipeline_mode<synchronous>, transform_indices = @transform_3, window_bounds = array<i64: 256, 784>}, {pipeline_mode = #tpu.pipeline_mode<synchronous>, transform_indices = @transform_4, window_bounds = array<i64: 1, 784>}, {transform_indices = @transform_5, window_bounds = array<i64: 32, 784>}]} {
    %c0 = arith.constant 0 : index
    %c0_0 = arith.constant 0 : index
    %0 = vector.load %arg3[%c0, %c0_0] : memref<3x256xf32, #tpu.memory_space<vmem>>, vector<3x256xf32>
    %c0_1 = arith.constant 0 : index
    %c0_2 = arith.constant 0 : index
    %1 = vector.load %arg1[%c0_1, %c0_2] : memref<32x128xf32, #tpu.memory_space<vmem>>, vector<32x128xf32>
    %2 = arith.truncf %1 : vector<32x128xf32> to vector<32x128xbf16>
    %c0_3 = arith.constant 0 : index
    %c0_4 = arith.constant 0 : index
    %3 = vector.load %arg2[%c0_3, %c0_4] : memref<128x256xbf16, #tpu.memory_space<vmem>>, vector<128x256xbf16>
    %cst = arith.constant dense<0.000000e+00> : vector<32x256xf32>
    %4 = tpu.matmul %2, %3, %cst {dimension_numbers = #tpu.dot_dimension_numbers<[1], [0], [0], [1], [0, 0, 1, 1], [], []>} : vector<32x128xbf16>, vector<128x256xbf16>, vector<32x256xf32> -> vector<32x256xf32>
    %5 = vector.extract_strided_slice %0 {offsets = [0, 0], sizes = [1, 256], strides = [1, 1]} : vector<3x256xf32> to vector<1x256xf32>
    %6 = vector.broadcast %5 : vector<1x256xf32> to vector<32x256xf32>
    %7 = arith.addf %4, %6 : vector<32x256xf32>
    %cst_5 = arith.constant dense<0.000000e+00> : vector<32xf32>
    %8 = vector.multi_reduction <add>, %7, %cst_5 [1] : vector<32x256xf32> to vector<32xf32>
    %9 = vector.shape_cast %8 : vector<32xf32> to vector<32x1xf32>
    %cst_6 = arith.constant 5.000000e-03 : f32
    %10 = vector.broadcast %cst_6 : f32 to vector<32x1xf32>
    %11 = arith.mulf %9, %10 : vector<32x1xf32>
    %12 = arith.mulf %7, %7 : vector<32x256xf32>
    %cst_7 = arith.constant dense<0.000000e+00> : vector<32xf32>
    %13 = vector.multi_reduction <add>, %12, %cst_7 [1] : vector<32x256xf32> to vector<32xf32>
    %14 = vector.shape_cast %13 : vector<32xf32> to vector<32x1xf32>
    %cst_8 = arith.constant 5.000000e-03 : f32
    %15 = vector.broadcast %cst_8 : f32 to vector<32x1xf32>
    %16 = arith.mulf %14, %15 : vector<32x1xf32>
    %17 = arith.mulf %11, %11 : vector<32x1xf32>
    %18 = arith.subf %16, %17 : vector<32x1xf32>
    %19 = vector.broadcast %11 : vector<32x1xf32> to vector<32x256xf32>
    %20 = arith.subf %7, %19 : vector<32x256xf32>
    %cst_9 = arith.constant 9.99999974E-6 : f32
    %21 = vector.broadcast %cst_9 : f32 to vector<32x1xf32>
    %22 = arith.addf %18, %21 : vector<32x1xf32>
    %23 = math.rsqrt %22 : vector<32x1xf32>
    %24 = vector.broadcast %23 : vector<32x1xf32> to vector<32x256xf32>
    %25 = arith.mulf %20, %24 : vector<32x256xf32>
    %26 = vector.extract_strided_slice %0 {offsets = [1, 0], sizes = [1, 256], strides = [1, 1]} : vector<3x256xf32> to vector<1x256xf32>
    %27 = vector.broadcast %26 : vector<1x256xf32> to vector<32x256xf32>
    %28 = arith.mulf %25, %27 : vector<32x256xf32>
    %29 = vector.extract_strided_slice %0 {offsets = [2, 0], sizes = [1, 256], strides = [1, 1]} : vector<3x256xf32> to vector<1x256xf32>
    %30 = vector.broadcast %29 : vector<1x256xf32> to vector<32x256xf32>
    %31 = arith.addf %28, %30 : vector<32x256xf32>
    %cst_10 = arith.constant 2.000000e-02 : f32
    %32 = vector.broadcast %cst_10 : f32 to vector<32x256xf32>
    %33 = arith.mulf %32, %31 : vector<32x256xf32>
    %34 = arith.maximumf %31, %33 : vector<32x256xf32>
    %35 = arith.truncf %34 : vector<32x256xf32> to vector<32x256xbf16>
    %c0_11 = arith.constant 0 : index
    %c0_12 = arith.constant 0 : index
    %36 = vector.load %arg4[%c0_11, %c0_12] : memref<256x784xbf16, #tpu.memory_space<vmem>>, vector<256x784xbf16>
    %cst_13 = arith.constant dense<0.000000e+00> : vector<32x784xf32>
    %37 = tpu.matmul %35, %36, %cst_13 {dimension_numbers = #tpu.dot_dimension_numbers<[1], [0], [0], [1], [0, 0, 1, 1], [], []>} : vector<32x256xbf16>, vector<256x784xbf16>, vector<32x784xf32> -> vector<32x784xf32>
    %c0_14 = arith.constant 0 : index
    %c0_15 = arith.constant 0 : index
    %38 = vector.load %arg5[%c0_14, %c0_15] : memref<1x784xf32, #tpu.memory_space<vmem>>, vector<1x784xf32>
    %39 = vector.broadcast %38 : vector<1x784xf32> to vector<32x784xf32>
    %40 = arith.addf %37, %39 : vector<32x784xf32>
    %cst_16 = arith.constant 0.000000e+00 : f32
    %41 = vector.broadcast %cst_16 : f32 to vector<32x784xf32>
    %42 = arith.subf %41, %40 : vector<32x784xf32>
    %43 = math.exp %42 : vector<32x784xf32>
    %cst_17 = arith.constant 1.000000e+00 : f32
    %44 = vector.broadcast %cst_17 : f32 to vector<32x784xf32>
    %45 = arith.addf %44, %43 : vector<32x784xf32>
    %cst_18 = arith.constant 1.000000e+00 : f32
    %46 = vector.broadcast %cst_18 : f32 to vector<32x784xf32>
    %47 = arith.divf %46, %45 : vector<32x784xf32>
    %c0_19 = arith.constant 0 : index
    %c0_20 = arith.constant 0 : index
    %48 = vector.load %arg6[%c0_19, %c0_20] : memref<32x784xf32, #tpu.memory_space<vmem>>, vector<32x784xf32>
    tpu.vector_store %arg6[%c0_19, %c0_20], %47 {strides = array<i32>} : memref<32x784xf32, #tpu.memory_space<vmem>>, vector<32x784xf32>,
    return
  }
  func.func @transform_0(%arg0: i32) -> (i32, i32) {
    %c0_i32 = arith.constant 0 : i32
    %c0_i32_0 = arith.constant 0 : i32
    return %arg0, %c0_i32 : i32, i32
  }
  func.func @transform_1(%arg0: i32) -> (i32, i32) {
    %c0_i32 = arith.constant 0 : i32
    %c0_i32_0 = arith.constant 0 : i32
    %c0_i32_1 = arith.constant 0 : i32
    return %c0_i32, %c0_i32_0 : i32, i32
  }
  func.func @transform_2(%arg0: i32) -> (i32, i32) {
    %c0_i32 = arith.constant 0 : i32
    %c0_i32_0 = arith.constant 0 : i32
    %c0_i32_1 = arith.constant 0 : i32
    return %c0_i32, %c0_i32_0 : i32, i32
  }
  func.func @transform_3(%arg0: i32) -> (i32, i32) {
    %c0_i32 = arith.constant 0 : i32
    %c0_i32_0 = arith.constant 0 : i32
    %c0_i32_1 = arith.constant 0 : i32
    return %c0_i32, %c0_i32_0 : i32, i32
  }
  func.func @transform_4(%arg0: i32) -> (i32, i32) {
    %c0_i32 = arith.constant 0 : i32
    %c0_i32_0 = arith.constant 0 : i32
    %c0_i32_1 = arith.constant 0 : i32
    return %c0_i32, %c0_i32_0 : i32, i32
  }
  func.func @transform_5(%arg0: i32) -> (i32, i32) {
    %c0_i32 = arith.constant 0 : i32
    %c0_i32_0 = arith.constant 0 : i32
    return %arg0, %c0_i32 : i32, i32
  }
}

</mosaic_0001>

<bundles_post_ra>
// kernel: generator_forward.1
= control target key start
LH: loop header
LB: loop body
LE: loop exit
PB: predicated region body
PF: predicated region fallthrough
CT: control target
= control target key end

     0   :  { %10 = vsyncpa [#allocation3], 0  ;;  %s3053_s0 = inlined_call_operand.vmem [shape: f32[64,128], index: 0, kind: input, shape index: {}]   ;;  %s3054_s1 = inlined_call_operand.vmem [shape: bf16[128,256], index: 1, kind: input, shape index: {}]   ;;  %s3055_s2 = inlined_call_operand.vmem [shape: f32[3,256], index: 2, kind: input, shape index: {}]   ;;  %s3056_s3 = inlined_call_operand.vmem [shape: bf16[256,784], index: 3, kind: input, shape index: {}]   ;;  %s3057_s4 = inlined_call_operand.vmem [shape: f32[1,784], index: 4, kind: input, shape index: {}]   ;;  %s3058_s5 = inlined_call_operand.hbm [shape: f32[64,784], index: 5, kind: output, shape index: {}]  }
   0x1   :  { %12 = vsyncpa [#allocation3 + $0x1], 0  ;;  %s2382_s18 = smov 0   ;;  %s2384_s19 = smov 0  }
   0x2   :  { %s2386_s20 = smov 0   ;;  %s2388_s21 = smov 0  }
   0x3 LB: > { %s2403_s22 = sadd.s32 4294967295, %s2346_s21   ;;  %s1769_s23 = sadd.s32 4294967294, %s2346_s21   ;;  %s2346_s21 = sphi %s2388_s21, %s3064_s21   ;;  %s2342_s20 = sphi %s2386_s20, %s3063_s20   ;;  %s2338_s19 = sphi %s2384_s19, %s3062_s19   ;;  %s2334_s18 = sphi %s2382_s18, %s3061_s18  }
   0x4   : > { %s2407_s24 = sadd.s32 1, %s2346_s21   ;;  %s135_s25 = sadd.s32 1, %s2342_s20 }
   0x5   : > { %s132_s26 = ssub.s32 %s2346_s21, %s2407_s24  ;;  %p145_p0 = scmp.ne.s32.totalorder %s2342_s20, %s2338_s19 }
   0x6   : > { %p133_p1 = scmp.eq.s32.totalorder %s132_s26, 0  ;;  %p146_p2 = scmp.eq.s32.totalorder %s2403_s22, 1 }
   0x7   : > { %p151_p3 = scmp.ne.s32.totalorder %s2338_s19, %s2334_s18  ;;  %p152_p4 = scmp.eq.s32.totalorder %s1769_s23, 1 }
   0x8   : > { %s2418_s27 = scalar_select %p133_p1, %s2342_s20, %s135_s25  }
   0x9   : > { %p2420_p5 = por %p146_p2, %p145_p0  ;;  %p2424_p6 = por %p152_p4, %p151_p3 }
   0xa   : > { %p1772_p7 = scmp.ge.s32.totalorder %s2346_s21, 1  ;;  %p191_p8 = scmp.lt.s32.totalorder %s2346_s21, 3 }
   0xc   : > { %p192_p9 = pnand %p1772_p7, %p191_p8 }
   0xd   : > { %v1980_v0 = vld [vmem:[%s3054_s1 + $0x4] ss:$8 sps:$4 sm:$0xff] (!%p192_p9)   ;;  %v1982_v1 = vld [vmem:[%s3054_s1] ss:$8 sps:$4 sm:$0xff] (!%p192_p9)   ;;  %v2348_v2 = vmov (!%p192_p9), 0   ;;  %s1773_s25 = sshll.u32 (!%p192_p9), %s2403_s22, 2  ;;  %v251_v54 = vlaneseq (!%p192_p9) }
   0xe   : > { %195 = sbr.rel (%p192_p9) target bundleno = 774 (0x306), region = 40  ;;  %381 = vmatprep.mubr.bf16.mxu0 (!%p192_p9), %v2348_v2  ;;  %349 = vmatprep.subr.bf16.mxu0 (!%p192_p9), %v1980_v0  ;;  %v1983_v3 = vld [vmem:[%s3054_s1 + $0x14] ss:$8 sps:$4 sm:$0xff] (!%p192_p9)   ;;  %v1985_v4 = vld [vmem:[%s3054_s1 + $0x10] ss:$8 sps:$4 sm:$0xff] (!%p192_p9)   ;;  %p220_p10 = scmp.lt.s32.totalorder (!%p192_p9), %s1773_s25, 7 }
   0xf   : > { %350 = vmatpush1.bf16.msra.mxu0 (!%p192_p9), %v1982_v1  ;;  %v1986_v5 = vld [vmem:[%s3054_s1 + $0x24] ss:$8 sps:$4 sm:$0xff] (!%p192_p9)   ;;  %v1988_v6 = vld [vmem:[%s3054_s1 + $0x20] ss:$8 sps:$4 sm:$0xff] (!%p192_p9)   ;;  %v1989_v7 = vld [vmem:[%s3054_s1 + $0x34] ss:$8 sps:$4 sm:$0xff] (!%p192_p9)  }
  0x10   : > { %351 = vmatprep.subr.bf16.mxu0 (!%p192_p9), %v1983_v3  ;;  %v1991_v8 = vld [vmem:[%s3054_s1 + $0x30] ss:$8 sps:$4 sm:$0xff] (!%p192_p9)   ;;  %v1992_v9 = vld [vmem:[%s3054_s1 + $0x44] ss:$8 sps:$4 sm:$0xff] (!%p192_p9)   ;;  %v1994_v10 = vld [vmem:[%s3054_s1 + $0x40] ss:$8 sps:$4 sm:$0xff] (!%p192_p9)  }
  0x11   : > { %v1995_v11 = vld [vmem:[%s3054_s1 + $0x54] ss:$8 sps:$4 sm:$0xff] (!%p192_p9)   ;;  %v1997_v12 = vld [vmem:[%s3054_s1 + $0x50] ss:$8 sps:$4 sm:$0xff] (!%p192_p9)   ;;  %v1998_v13 = vld [vmem:[%s3054_s1 + $0x64] ss:$8 sps:$4 sm:$0xff] (!%p192_p9)  }
  0x12   : > { %v2000_v14 = vld [vmem:[%s3054_s1 + $0x60] ss:$8 sps:$4 sm:$0xff] (!%p192_p9)   ;;  %v2001_v15 = vld [vmem:[%s3054_s1 + $0x74] ss:$8 sps:$4 sm:$0xff] (!%p192_p9)   ;;  %v2003_v16 = vld [vmem:[%s3054_s1 + $0x70] ss:$8 sps:$4 sm:$0xff] (!%p192_p9)  }
  0x13   : > { %352 = vmatpush1.bf16.msra.mxu0 (!%p192_p9), %v1985_v4  ;;  %v2004_v23 = vld [vmem:[%s3056_s3 + $0x4] ss:$28 sps:$4 sm:$0xff] (!%p192_p9)   ;;  %v2008_v25 = vld [vmem:[%s3056_s3 + $0xc] ss:$28 sps:$4 sm:$0xff] (!%p192_p9)   ;;  %v2010_v27 = vld [vmem:[%s3056_s3 + $0x3c] ss:$28 sps:$4 sm:$0xff] (!%p192_p9)  }
  0x14   : > { %353 = vmatprep.subr.bf16.mxu0 (!%p192_p9), %v1986_v5  ;;  %v2006_v24 = vld [vmem:[%s3056_s3 + $0x8] ss:$28 sps:$4 sm:$0xff] (!%p192_p9)   ;;  %v2009_v26 = vld [vmem:[%s3056_s3] ss:$28 sps:$4 sm:$0xff] (!%p192_p9)   ;;  %1287 = vmatprep.subr.bf16.mxu1 (!%p192_p9), %v2004_v23  ;;  %v2015_v30 = vld [vmem:[%s3056_s3 + $0x38] ss:$28 sps:$4 sm:$0xff] (!%p192_p9)  }
  0x15   : > { %s3066_s25 = smov (!%p220_p10, %s1773_s25), 7  ;;  %v2014_v28 = vld [vmem:[%s3056_s3 + $0x44] ss:$28 sps:$4 sm:$0xff]   ;;  %1288 = vmatpush1.bf16.msra.mxu1 %v2009_v26  ;;  %v2016_v31 = vld [vmem:[%s3056_s3 + $0x74] ss:$28 sps:$4 sm:$0xff]   ;;  %v2575_v55 = vshrl.u32 %v251_v54, 7 }
  0x16   : > { %s1774_s16 = sshll.u32 %s3066_s25, 3  ;;  %v2012_v29 = vld [vmem:[%s3056_s3 + $0x40] ss:$28 sps:$4 sm:$0xff]   ;;  %1289 = vmatprep.subr.bf16.mxu1 %v2010_v27  ;;  %v2018_v33 = vld [vmem:[%s3056_s3 + $0x78] ss:$28 sps:$4 sm:$0xff]   ;;  %s216_s14 = sand.u32 1, %s2338_s19  }
  0x17   : > { %354 = vmatpush1.bf16.msra.mxu0 %v1988_v6  ;;  %s223_s8 = scalar_lea.vmem %s3053_s0, %s1774_s16  ;;  %v2020_v32 = vld [vmem:[%s3056_s3 + $0x7c] ss:$28 sps:$4 sm:$0xff]   ;;  %v2021_v34 = vld [vmem:[%s3056_s3 + $0x70] ss:$28 sps:$4 sm:$0xff]   ;;  %v2027_v38 = vld [vmem:[%s3056_s3 + $0xa8] ss:$28 sps:$4 sm:$0xff]  }
  0x18   : > { %355 = vmatprep.subr.bf16.mxu0 %v1989_v7  ;;  %v228_v17 = vld [vmem:[%s223_s8] sm:$0xff]  ;;  %v229_v18 = vld [vmem:[%s223_s8 + $0x8] sm:$0xff]  ;;  %v230_v20 = vld [vmem:[%s223_s8 + $0x10] sm:$0xff]  ;;  %v2578_v56 = vsub.s32 0, %v2575_v55  ;;  %v257_v58 = vsub.s32 4, %v2575_v55  ;;  %s1936_s15 = smul.u32 224, %s216_s14 }
  0x19   : > { %v232_v19 = vpack.c.bf16 %v229_v18, %v228_v17  ;;  %v231_v21 = vld [vmem:[%s223_s8 + $0x18] sm:$0xff]  ;;  %1290 = vmatpush1.bf16.msra.mxu1 %v2015_v30  ;;  %v2022_v35 = vld [vmem:[%s3056_s3 + $0xac] ss:$28 sps:$4 sm:$0xff]   ;;  %v2026_v36 = vld [vmem:[%s3056_s3 + $0xb4] ss:$28 sps:$4 sm:$0xff]   ;;  %vm1669_vm0 = vcmask 130048  }
  0x1a   : > { %v233_v22 = vpack.c.bf16 %v231_v21, %v230_v20  ;;  %1291 = vmatprep.subr.bf16.mxu1 %v2016_v31  ;;  %v2024_v37 = vld [vmem:[%s3056_s3 + $0xb0] ss:$28 sps:$4 sm:$0xff]   ;;  %v2028_v39 = vld [vmem:[%s3056_s3 + $0xe4] ss:$28 sps:$4 sm:$0xff]   ;;  %v2034_v43 = vld [vmem:[%s3056_s3 + $0x11c] ss:$28 sps:$4 sm:$0xff]  }
  0x1b   : > { %356 = vmatpush1.bf16.msra.mxu0 %v1991_v8  ;;  %v2032_v40 = vld [vmem:[%s3056_s3 + $0xec] ss:$28 sps:$4 sm:$0xff]   ;;  %v2033_v42 = vld [vmem:[%s3056_s3 + $0xe0] ss:$28 sps:$4 sm:$0xff]   ;;  %v2039_v46 = vld [vmem:[%s3056_s3 + $0x118] ss:$28 sps:$4 sm:$0xff]  }
  0x1c   : > { %357 = vmatprep.subr.bf16.mxu0 %v1992_v9  ;;  %v2030_v41 = vld [vmem:[%s3056_s3 + $0xe8] ss:$28 sps:$4 sm:$0xff]   ;;  %v2036_v45 = vld [vmem:[%s3056_s3 + $0x120] ss:$28 sps:$4 sm:$0xff]   ;;  %v2040_v47 = vld [vmem:[%s3056_s3 + $0x154] ss:$28 sps:$4 sm:$0xff]  }
  0x1d   : > { %1292 = vmatpush1.bf16.msra.mxu1 %v2021_v34  ;;  %v2038_v44 = vld [vmem:[%s3056_s3 + $0x124] ss:$28 sps:$4 sm:$0xff]   ;;  %v2044_v48 = vld [vmem:[%s3056_s3 + $0x15c] ss:$28 sps:$4 sm:$0xff]   ;;  %v2045_v50 = vld [vmem:[%s3056_s3 + $0x150] ss:$28 sps:$4 sm:$0xff]  }
  0x1e   : > { %1293 = vmatprep.subr.bf16.mxu1 %v2022_v35  ;;  %v2042_v49 = vld [vmem:[%s3056_s3 + $0x158] ss:$28 sps:$4 sm:$0xff]   ;;  %v2046_v51 = vld [vmem:[%s3056_s3 + $0x18c] ss:$28 sps:$4 sm:$0xff]   ;;  %v2583_v57 = vld [vmem:[%s3055_s2] sm:$0x77] }
  0x1f   : > { %358 = vmatpush1.bf16.msra.mxu0 %v1994_v10  ;;  %v2050_v52 = vld [vmem:[%s3056_s3 + $0x194] ss:$28 sps:$4 sm:$0xff]   ;;  %v254_v59 = vrot.slane %v2583_v57, %v2578_v56  ;;  %v258_v60 = vrot.slane %v2583_v57, %v257_v58  ;;  %v2051_v31 = vld [vmem:[%s3056_s3 + $0x188] ss:$28 sps:$4 sm:$0xff]   ;;  %v2057_v35 = vld [vmem:[%s3056_s3 + $0x1c0] ss:$28 sps:$4 sm:$0xff]  }
  0x20   : > { %359 = vmatprep.subr.bf16.mxu0 %v1995_v11  ;;  %v2048_v53 = vld [vmem:[%s3056_s3 + $0x190] ss:$28 sps:$4 sm:$0xff]   ;;  %v2054_v34 = vld [vmem:[%s3056_s3 + $0x1c8] ss:$28 sps:$4 sm:$0xff]   ;;  %v2084_v54 = vld [vmem:[%s3056_s3 + $0x2e0] ss:$28 sps:$4 sm:$0xff]  }
  0x21   : > { %1294 = vmatpush1.bf16.msra.mxu1 %v2027_v38  ;;  %v264_v61 = vrot.slane %v254_v59, %v2578_v56  ;;  %v268_v62 = vrot.slane %v258_v60, %v2578_v56  ;;  %v2060_v38 = vld [vmem:[%s3056_s3 + $0x200] ss:$28 sps:$4 sm:$0xff]   ;;  %v2087_v59 = vld [vmem:[%s3056_s3 + $0x2d8] ss:$28 sps:$4 sm:$0xff]   ;;  %s2958_s16 = scalar_lea.vmem [#allocation2], %s1936_s15  ;;  %s1937_s17 = smul.u32 3584, %s2403_s22 }
  0x22   : > { %1295 = vmatprep.subr.bf16.mxu1 %v2028_v39  ;;  %v2063_v39 = vld [vmem:[%s3056_s3 + $0x1f8] ss:$28 sps:$4 sm:$0xff]   ;;  %s1707_s23 = sshll.u32 %s2958_s16, 4  ;;  %s3012_s22 = scalar_lea.sflag [#allocation3], %s216_s14  ;;  %s3000_s23 = int_to_ptr.vmem [resolvable:$true] %s1707_s23 }
  0x23   : > { %360 = vmatpush1.bf16.msra.mxu0 %v1997_v12  ;;  %v2088_v60 = vld [vmem:[%s3056_s3 + $0x314] ss:$28 sps:$4 sm:$0xff]   ;;  %s3006_s6 = scalar_lea.hbm %s3058_s5, %s1937_s17  ;;  %s2284_s7 = scalar_lea.vmem %s3000_s23, 3584 }
  0x24   : > { %361 = vmatprep.subr.bf16.mxu0 %v1998_v13  ;;  %p2285_p11 = scmp.ne.s32.totalorder %s3000_s23, %s2284_s7  ;;  %s2349_s8 = smov [#allocation2]  }
  0x25   : > { %1296 = vmatpush1.bf16.msra.mxu1 %v2033_v42  ;;  %v2066_v42 = vld [vmem:[%s3056_s3 + $0x238] ss:$28 sps:$4 sm:$0xff]   ;;  %s2288_s9 = sshll.u32 %s2349_s8, 4  ;;  %s2289_s9 = int_to_ptr.vmem [resolvable:$false] %s2288_s9 }
  0x26   : > { %1297 = vmatprep.subr.bf16.mxu1 %v2034_v43  ;;  %v2069_v43 = vld [vmem:[%s3056_s3 + $0x230] ss:$28 sps:$4 sm:$0xff]   ;;  %p2286_p12 = pnand %p2285_p11, %p2420_p5  ;;  %s2290_s10 = scalar_lea.vmem %s2289_s9, 7168 }
  0x27   : > { %362 = vmatpush1.bf16.msra.mxu0 %v2000_v14  ;;  %p2291_p0 = scmp.lt.s32.totalorder %s3000_s23, %s2289_s9  ;;  %p2292_p1 = scmp.lt.s32.totalorder %s2290_s10, %s2284_s7 }
  0x28   : > { %363 = vmatprep.subr.bf16.mxu0 %v2001_v15  ;;  %p2287_p13 = pneg %p2286_p12 }
  0x29   : > { %1298 = vmatpush1.bf16.msra.mxu1 %v2039_v46  ;;  %v2072_v46 = vld [vmem:[%s3056_s3 + $0x270] ss:$28 sps:$4 sm:$0xff]   ;;  %p2293_p2 = por %p2292_p1, %p2291_p0 }
  0x2a   : > { %1299 = vmatprep.subr.bf16.mxu1 %v2040_v47  ;;  %v2075_v47 = vld [vmem:[%s3056_s3 + $0x268] ss:$28 sps:$4 sm:$0xff]  }
  0x2b   : > { %364 = vmatpush1.bf16.msra.mxu0 %v2003_v16  ;;  %p2294_p3 = pnand %p2293_p2, %p2287_p13 }
  0x2c   : > { %1340 = vmatprep.subr.bf16.mxu0 %v2008_v25 }
  0x2d   : > { %1300 = vmatpush1.bf16.msra.mxu1 %v2045_v50  ;;  %v2078_v50 = vld [vmem:[%s3056_s3 + $0x2a8] ss:$28 sps:$4 sm:$0xff]  }
  0x2e   : > { %382 = vmatmul.mubr.bf16.vlgmr.msra.gmra.mrb[0].mxu0 %v232_v19  ;;  %1301 = vmatprep.subr.bf16.mxu1 %v2046_v51  ;;  %v2081_v51 = vld [vmem:[%s3056_s3 + $0x2a0] ss:$28 sps:$4 sm:$0xff]  }
  0x2f   : > { %391 = vmatprep.mubr.bf16.mxu0 %v2348_v2  ;;  %1341 = vmatpush1.bf16.msra.mxu0 %v2006_v24 }
  0x30   : > { %1342 = vmatprep.subr.bf16.mxu0 %v2014_v28 }
  0x31   : > { %1302 = vmatpush1.bf16.msra.mxu1 %v2051_v31  ;;  %v480_v31 = vsub.s32 5, %v2575_v55 }
  0x33   : > { %1343 = vmatpush1.bf16.msra.mxu0 %v2012_v29 }
  0x34   : > { %1344 = vmatprep.subr.bf16.mxu0 %v2020_v32  ;;  %v2052_v32 = vld [vmem:[%s3056_s3 + $0x1c4] ss:$28 sps:$4 sm:$0xff]  }
  0x35   : > { %1303 = vmatprep.subr.bf16.mxu1 %v2052_v32 }
  0x36   : > { %392 = vmatmul.mubr.bf16.gmra.mrb[4].mxu0 %v233_v22  ;;  %1304 = vmatpush1.bf16.msra.mxu1 %v2057_v35 }
  0x37   : > { %1345 = vmatpush1.bf16.msra.mxu0 %v2018_v33  ;;  %v2056_v33 = vld [vmem:[%s3056_s3 + $0x1cc] ss:$28 sps:$4 sm:$0xff]  }
  0x38   : > { %1346 = vmatprep.subr.bf16.mxu0 %v2026_v36  ;;  %v2058_v36 = vld [vmem:[%s3056_s3 + $0x1fc] ss:$28 sps:$4 sm:$0xff]  }
  0x39   : > { %1305 = vmatprep.subr.bf16.mxu1 %v2058_v36 }
  0x3a   : > { %1306 = vmatpush1.bf16.msra.mxu1 %v2063_v39  ;;  %v506_v39 = vsub.s32 6, %v2575_v55 }
  0x3b   : > { %1347 = vmatpush1.bf16.msra.mxu0 %v2024_v37  ;;  %v2062_v37 = vld [vmem:[%s3056_s3 + $0x204] ss:$28 sps:$4 sm:$0xff]  }
  0x3c   : > { %1348 = vmatprep.subr.bf16.mxu0 %v2032_v40  ;;  %v2064_v40 = vld [vmem:[%s3056_s3 + $0x234] ss:$28 sps:$4 sm:$0xff]  }
  0x3d   : > { %1307 = vmatprep.subr.bf16.mxu1 %v2064_v40 }
  0x3e   : > { %1308 = vmatpush1.bf16.msra.mxu1 %v2069_v43 }
  0x3f   : > { %1349 = vmatpush1.bf16.msra.mxu0 %v2030_v41  ;;  %v2068_v41 = vld [vmem:[%s3056_s3 + $0x23c] ss:$28 sps:$4 sm:$0xff]  }
  0x40   : > { %1350 = vmatprep.subr.bf16.mxu0 %v2038_v44  ;;  %v2070_v44 = vld [vmem:[%s3056_s3 + $0x26c] ss:$28 sps:$4 sm:$0xff]  }
  0x41   : > { %1309 = vmatprep.subr.bf16.mxu1 %v2070_v44 }
  0x42   : > { %1310 = vmatpush1.bf16.msra.mxu1 %v2075_v47  ;;  %v507_v47 = vrot.slane %v2583_v57, %v506_v39 }
  0x43   : > { %1351 = vmatpush1.bf16.msra.mxu0 %v2036_v45  ;;  %v2074_v45 = vld [vmem:[%s3056_s3 + $0x274] ss:$28 sps:$4 sm:$0xff]  }
  0x44   : > { %1352 = vmatprep.subr.bf16.mxu0 %v2044_v48  ;;  %v2076_v48 = vld [vmem:[%s3056_s3 + $0x2a4] ss:$28 sps:$4 sm:$0xff]  }
  0x45   : > { %1311 = vmatprep.subr.bf16.mxu1 %v2076_v48 }
  0x46   : > { %1312 = vmatpush1.bf16.msra.mxu1 %v2081_v51 }
  0x47   : > { %1353 = vmatpush1.bf16.msra.mxu0 %v2042_v49  ;;  %v2080_v49 = vld [vmem:[%s3056_s3 + $0x2ac] ss:$28 sps:$4 sm:$0xff]  }
  0x48   : > { %1354 = vmatprep.subr.bf16.mxu0 %v2050_v52  ;;  %v2082_v52 = vld [vmem:[%s3056_s3 + $0x2dc] ss:$28 sps:$4 sm:$0xff]  }
  0x49   : > { %1313 = vmatprep.subr.bf16.mxu1 %v2082_v52 }
  0x4a   : > { %1314 = vmatpush1.bf16.msra.mxu1 %v2087_v59 }
  0x4b   : > { %1355 = vmatpush1.bf16.msra.mxu0 %v2048_v53  ;;  %v2086_v53 = vld [vmem:[%s3056_s3 + $0x2e4] ss:$28 sps:$4 sm:$0xff]   ;;  %1315 = vmatprep.subr.bf16.mxu1 %v2088_v60 }
  0x4c   : > { %1356 = vmatprep.subr.bf16.mxu0 %v2056_v33 }
  0x4f   : > { %1357 = vmatpush1.bf16.msra.mxu0 %v2054_v34 }
  0x50   : > { %1358 = vmatprep.subr.bf16.mxu0 %v2062_v37 }
  0x53   : > { %1359 = vmatpush1.bf16.msra.mxu0 %v2060_v38  ;;  %v2743_v38 = vsub.s32 2, %v2575_v55 }
  0x54   : > { %1360 = vmatprep.subr.bf16.mxu0 %v2068_v41  ;;  %v481_v41 = vrot.slane %v2583_v57, %v480_v31 }
  0x55   : > { %v503_v48 = vrot.slane %v2583_v57, %v2743_v38 }
  0x57   : > { %1361 = vmatpush1.bf16.msra.mxu0 %v2066_v42 }
  0x58   : > { %1362 = vmatprep.subr.bf16.mxu0 %v2074_v45 }
  0x5b   : > { %1363 = vmatpush1.bf16.msra.mxu0 %v2072_v46 }
  0x5c   : > { %1364 = vmatprep.subr.bf16.mxu0 %v2080_v49 }
  0x5f   : > { %1365 = vmatpush1.bf16.msra.mxu0 %v2078_v50 }
  0x60   : > { %1366 = vmatprep.subr.bf16.mxu0 %v2086_v53 }
  0x63   : > { %1367 = vmatpush1.bf16.msra.mxu0 %v2084_v54 }
 0x101   : > { %v383_v63 = vpop.f32.mrb[0].mxu0 }
 0x102   : > { %v2593_v0 = vadd.f32 %v383_v63, %v264_v61  ;;  %v385_v1 = vpop.f32.mrb[1].mxu0  ;;  %v2093_v63 = vld [vmem:[%s3056_s3 + $0x310] ss:$28 sps:$4 sm:$0xff]  }
 0x103   : > { %v2595_v2 = vadd.f32 %v385_v1, %v268_v62  ;;  %v387_v3 = vpop.f32.mrb[2].mxu0  ;;  %1316 = vmatpush1.bf16.msra.mxu1 %v2093_v63  ;;  %v2094_v1 = vld [vmem:[%s3056_s3 + $0x34c] ss:$28 sps:$4 sm:$0xff]  }
 0x104   : > { %v2597_v4 = vadd.f32 %v387_v3, %v264_v61  ;;  %v389_v5 = vpop.f32.mrb[3].mxu0  ;;  %v418_v6 = vmul.f32 %v2593_v0, %v2593_v0  ;;  %v2098_v3 = vld [vmem:[%s3056_s3 + $0x354] ss:$28 sps:$4 sm:$0xff]   ;;  %1317 = vmatprep.subr.bf16.mxu1 %v2094_v1 }
 0x105   : > { %v2601_v7 = vadd.f32 %v389_v5, %v268_v62  ;;  %v402_v8 = vadd.f32 %v2595_v2, %v2593_v0  ;;  %v419_v9 = vmul.f32 %v2595_v2, %v2595_v2  ;;  %v2096_v5 = vld [vmem:[%s3056_s3 + $0x350] ss:$28 sps:$4 sm:$0xff]  }
 0x106   : > { %v420_v11 = vmul.f32 %v2597_v4, %v2597_v4 }
 0x107   : > { %403 = vadd.xlane.f32.xlu0 %v402_v8  ;;  %v426_v10 = vadd.f32 %v419_v9, %v418_v6  ;;  %v421_v12 = vmul.f32 %v2601_v7, %v2601_v7  ;;  %v405_v14 = vadd.f32 %v2601_v7, %v2597_v4  ;;  %v2099_v6 = vld [vmem:[%s3056_s3 + $0x348] ss:$28 sps:$4 sm:$0xff]   ;;  %v2102_v8 = vld [vmem:[%s3056_s3 + $0x14] ss:$28 sps:$4 sm:$0xff]  }
 0x108   : > { %1318 = vmatpush1.bf16.msra.mxu1 %v2099_v6  ;;  %v2103_v9 = vld [vmem:[%s3056_s3 + $0x1d8] ss:$28 sps:$4 sm:$0xff]  }
 0x109   : > { %v393_v13 = vpop.f32.mrb[4].mxu0  ;;  %427 = vadd.xlane.f32.xlu1 %v426_v10  ;;  %v429_v19 = vadd.f32 %v421_v12, %v420_v11  ;;  %1393 = vmatprep.subr.bf16.mxu1 %v2102_v8 }
 0x10a   : > { %v2613_v15 = vadd.f32 %v393_v13, %v264_v61  ;;  %v395_v16 = vpop.f32.mrb[5].mxu0 }
 0x10b   : > { %v2615_v17 = vadd.f32 %v395_v16, %v268_v62  ;;  %v397_v18 = vpop.f32.mrb[6].mxu0  ;;  %406 = vadd.xlane.f32.xlu0 %v405_v14 }
 0x10c   : > { %v2617_v20 = vadd.f32 %v397_v18, %v264_v61  ;;  %v399_v21 = vpop.f32.mrb[7].mxu0  ;;  %v422_v22 = vmul.f32 %v2613_v15, %v2613_v15  ;;  %v2092_v61 = vld [vmem:[%s3056_s3 + $0x31c] ss:$28 sps:$4 sm:$0xff]  }
 0x10d   : > { %v2621_v23 = vadd.f32 %v399_v21, %v268_v62  ;;  %430 = vadd.xlane.f32.xlu1 %v429_v19  ;;  %v408_v24 = vadd.f32 %v2615_v17, %v2613_v15  ;;  %v423_v25 = vmul.f32 %v2615_v17, %v2615_v17  ;;  %v2090_v62 = vld [vmem:[%s3056_s3 + $0x318] ss:$28 sps:$4 sm:$0xff]   ;;  %1368 = vmatprep.subr.bf16.mxu0 %v2092_v61 }
 0x10e   : > { %v424_v26 = vmul.f32 %v2617_v20, %v2617_v20  ;;  %1369 = vmatpush1.bf16.msra.mxu0 %v2090_v62  ;;  %v517_v61 = vrot.slane %v507_v47, %v2743_v38  ;;  %v513_v62 = vrot.slane %v503_v48, %v2743_v38 }
 0x10f   : > { %409 = vadd.xlane.f32.xlu0 %v408_v24  ;;  %v411_v27 = vadd.f32 %v2621_v23, %v2617_v20  ;;  %v432_v28 = vadd.f32 %v423_v25, %v422_v22  ;;  %v425_v29 = vmul.f32 %v2621_v23, %v2621_v23  ;;  %1370 = vmatprep.subr.bf16.mxu0 %v2098_v3 }
 0x111   : > { %412 = vadd.xlane.f32.xlu1 %v411_v27  ;;  %v435_v30 = vadd.f32 %v425_v29, %v424_v26 }
 0x112   : > { %1371 = vmatpush1.bf16.msra.mxu0 %v2096_v5 }
 0x113   : > { %433 = vadd.xlane.f32.xlu0 %v432_v28  ;;  %1908 = vmatprep.subr.bf16.mxu0 %v2103_v9 }
 0x115   : > { %436 = vadd.xlane.f32.xlu1 %v435_v30  ;;  %v2739_v30 = vsub.s32 1, %v2575_v55 }
 0x117   : > { %v477_v42 = vrot.slane %v2583_v57, %v2739_v30  ;;  %v491_v51 = vrot.slane %v481_v41, %v2739_v30 }
 0x119   : > { %v487_v52 = vrot.slane %v477_v42, %v2739_v30  ;;  %v2104_v42 = vld [vmem:[%s3056_s3 + $0x18] ss:$28 sps:$4 sm:$0xff]  }
 0x194   : > { %v404_v10 = vpop.xlane.xlu0 %403 }
 0x195   : > { %v414_v11 = vmul.f32 0.005, %v404_v10 }
 0x196   : > { %v428_v12 = vpop.xlane.xlu1 %427 }
 0x197   : > { %v438_v13 = vmul.f32 0.005, %v428_v12  ;;  %v442_v14 = vmul.f32 %v414_v11, %v414_v11  ;;  %v450_v49 = vsub.f32 %v2593_v0, %v414_v11  ;;  %v451_v50 = vsub.f32 %v2595_v2, %v414_v11 }
 0x198   : > { %v407_v16 = vpop.xlane.xlu0 %406 }
 0x199   : > { %v446_v18 = vsub.f32 %v438_v13, %v442_v14  ;;  %v415_v19 = vmul.f32 0.005, %v407_v16 }
 0x19a   : > { %v431_v21 = vpop.xlane.xlu1 %430 }
 0x19b   : > { %v458_v22 = vadd.f32 1e-05, %v446_v18  ;;  %v439_v24 = vmul.f32 0.005, %v431_v21  ;;  %v443_v25 = vmul.f32 %v415_v19, %v415_v19  ;;  %v452_v0 = vsub.f32 %v2597_v4, %v415_v19 }
 0x19c   : > { %v410_v26 = vpop.xlane.xlu0 %409  ;;  %v453_v2 = vsub.f32 %v2601_v7, %v415_v19 }
 0x19d   : > { %2164 = vrsqrt.f32 %v458_v22  ;;  %v416_v27 = vmul.f32 0.005, %v410_v26  ;;  %v447_v28 = vsub.f32 %v439_v24, %v443_v25 }
 0x19e   : > { %v413_v29 = vpop.xlane.xlu1 %412 }
 0x19f   : > { %v417_v32 = vmul.f32 0.005, %v413_v29  ;;  %v444_v33 = vmul.f32 %v416_v27, %v416_v27  ;;  %v459_v34 = vadd.f32 1e-05, %v447_v28  ;;  %v454_v11 = vsub.f32 %v2613_v15, %v416_v27 }
 0x1a0   : > { %v434_v35 = vpop.xlane.xlu0 %433  ;;  %v455_v12 = vsub.f32 %v2615_v17, %v416_v27 }
 0x1a1   : > { %v440_v36 = vmul.f32 0.005, %v434_v35  ;;  %v445_v37 = vmul.f32 %v417_v32, %v417_v32  ;;  %2166 = vrsqrt.f32 %v459_v34  ;;  %v456_v4 = vsub.f32 %v2617_v20, %v417_v32 }
 0x1a2   : > { %v437_v40 = vpop.xlane.xlu1 %436  ;;  %v457_v7 = vsub.f32 %v2621_v23, %v417_v32  ;;  %v2100_v23 = vld [vmem:[%s3056_s3 + $0x10] ss:$28 sps:$4 sm:$0xff]  }
 0x1a3   : > { %v448_v43 = vsub.f32 %v440_v36, %v444_v33  ;;  %v441_v44 = vmul.f32 0.005, %v437_v40 }
 0x1a5   : > { %v460_v45 = vadd.f32 1e-05, %v448_v43  ;;  %v449_v46 = vsub.f32 %v441_v44, %v445_v37  ;;  %v2107_v43 = vld [vmem:[%s3056_s3 + $0x4c] ss:$28 sps:$4 sm:$0xff]  }
 0x1a6   : > { %v2108_v44 = vld [vmem:[%s3056_s3 + $0x210] ss:$28 sps:$4 sm:$0xff]  }
 0x1a7   : > { %v2165_v53 = vpop.eup %2164  ;;  %2168 = vrsqrt.f32 %v460_v45  ;;  %v461_v54 = vadd.f32 1e-05, %v449_v46 }
 0x1a8   : > { %v466_v59 = vmul.f32 %v2165_v53, %v450_v49  ;;  %v467_v60 = vmul.f32 %v2165_v53, %v451_v50 }
 0x1a9   : > { %2170 = vrsqrt.f32 %v461_v54 }
 0x1aa   : > { %v493_v63 = vmul.f32 %v491_v51, %v467_v60  ;;  %v492_v57 = vmul.f32 %v487_v52, %v466_v59 }
 0x1ab   : > { %v2167_v1 = vpop.eup %2166 }
 0x1ac   : > { %v468_v3 = vmul.f32 %v2167_v1, %v452_v0  ;;  %v469_v5 = vmul.f32 %v2167_v1, %v453_v2  ;;  %v519_v6 = vadd.f32 %v517_v61, %v493_v63  ;;  %v518_v8 = vadd.f32 %v513_v62, %v492_v57  ;;  %v2110_v0 = vld [vmem:[%s3056_s3 + $0x80] ss:$28 sps:$4 sm:$0xff]   ;;  %v2114_v2 = vld [vmem:[%s3056_s3 + $0x88] ss:$28 sps:$4 sm:$0xff]  }
 0x1ad   : > { %v2117_v1 = vld [vmem:[%s3056_s3 + $0xbc] ss:$28 sps:$4 sm:$0xff]  }
 0x1ae   : > { %v495_v9 = vmul.f32 %v491_v51, %v469_v5  ;;  %v494_v10 = vmul.f32 %v487_v52, %v468_v3  ;;  %v527_v16 = vmul.f32 0.02, %v519_v6  ;;  %v526_v21 = vmul.f32 0.02, %v518_v8  ;;  %v2118_v3 = vld [vmem:[%s3056_s3 + $0x280] ss:$28 sps:$4 sm:$0xff]  }
 0x1af   : > { %v2115_v5 = vld [vmem:[%s3056_s3 + $0xb8] ss:$28 sps:$4 sm:$0xff]  }
 0x1b0   : > { %v521_v14 = vadd.f32 %v517_v61, %v495_v9  ;;  %v520_v18 = vadd.f32 %v513_v62, %v494_v10  ;;  %v535_v34 = vmax.f32 %v519_v6, %v527_v16  ;;  %v534_v27 = vmax.f32 %v518_v8, %v526_v21  ;;  %v2119_v6 = vld [vmem:[%s3056_s3 + $0xc0] ss:$28 sps:$4 sm:$0xff]   ;;  %v2122_v8 = vld [vmem:[%s3056_s3 + $0xf4] ss:$28 sps:$4 sm:$0xff]   ;;  %v2133_v21 = vld [vmem:[%s3056_s3 + $0x328] ss:$28 sps:$4 sm:$0xff]  }
 0x1b1   : > { %v2169_v13 = vpop.eup %2168  ;;  %v2123_v9 = vld [vmem:[%s3056_s3 + $0x2b8] ss:$28 sps:$4 sm:$0xff]   ;;  %v2120_v10 = vld [vmem:[%s3056_s3 + $0xf0] ss:$28 sps:$4 sm:$0xff]  }
 0x1b2   : > { %v470_v19 = vmul.f32 %v2169_v13, %v454_v11  ;;  %v471_v22 = vmul.f32 %v2169_v13, %v455_v12  ;;  %v529_v25 = vmul.f32 0.02, %v521_v14  ;;  %v528_v26 = vmul.f32 0.02, %v520_v18  ;;  %v2124_v11 = vld [vmem:[%s3056_s3 + $0xf8] ss:$28 sps:$4 sm:$0xff]  }
 0x1b3   : > { %v2171_v24 = vpop.eup %2170  ;;  %v2127_v12 = vld [vmem:[%s3056_s3 + $0x12c] ss:$28 sps:$4 sm:$0xff]  }
 0x1b4   : > { %v472_v28 = vmul.f32 %v2171_v24, %v456_v4  ;;  %v473_v29 = vmul.f32 %v2171_v24, %v457_v7  ;;  %v497_v33 = vmul.f32 %v491_v51, %v471_v22  ;;  %v496_v15 = vmul.f32 %v487_v52, %v470_v19  ;;  %v2128_v13 = vld [vmem:[%s3056_s3 + $0x2f0] ss:$28 sps:$4 sm:$0xff]   ;;  %v2130_v4 = vld [vmem:[%s3056_s3 + $0x160] ss:$28 sps:$4 sm:$0xff]   ;;  %v2134_v7 = vld [vmem:[%s3056_s3 + $0x168] ss:$28 sps:$4 sm:$0xff]  }
 0x1b5   : > { %v537_v17 = vmax.f32 %v521_v14, %v529_v25  ;;  %v536_v35 = vmax.f32 %v520_v18, %v528_v26  ;;  %v2125_v14 = vld [vmem:[%s3056_s3 + $0x128] ss:$28 sps:$4 sm:$0xff]   ;;  %v2129_v16 = vld [vmem:[%s3056_s3 + $0x130] ss:$28 sps:$4 sm:$0xff]   ;;  %v2137_v19 = vld [vmem:[%s3056_s3 + $0x19c] ss:$28 sps:$4 sm:$0xff]  }
 0x1b6   : > { %v499_v36 = vmul.f32 %v491_v51, %v473_v29  ;;  %v523_v37 = vadd.f32 %v517_v61, %v497_v33  ;;  %v498_v40 = vmul.f32 %v487_v52, %v472_v28  ;;  %v522_v41 = vadd.f32 %v513_v62, %v496_v15  ;;  %v2105_v51 = vld [vmem:[%s3056_s3 + $0x48] ss:$28 sps:$4 sm:$0xff]   ;;  %v2109_v52 = vld [vmem:[%s3056_s3 + $0x50] ss:$28 sps:$4 sm:$0xff]   ;;  %v2138_v22 = vld [vmem:[%s3056_s3 + $0x360] ss:$28 sps:$4 sm:$0xff]  }
 0x1b7   : > { %v543_v20 = vpack.c.bf16 %v537_v17, %v535_v34  ;;  %v2771_v32 = vpack.c.bf16 %v536_v35, %v534_v27  ;;  %v2132_v18 = vld [vmem:[%s3056_s3 + $0x164] ss:$28 sps:$4 sm:$0xff]   ;;  %v2135_v24 = vld [vmem:[%s3056_s3 + $0x198] ss:$28 sps:$4 sm:$0xff]   ;;  %v2140_v28 = vld [vmem:[%s3056_s3 + $0x1d0] ss:$28 sps:$4 sm:$0xff]  }
 0x1b8   : > { %v525_v45 = vadd.f32 %v517_v61, %v499_v36  ;;  %v531_v46 = vmul.f32 0.02, %v523_v37  ;;  %v524_v47 = vadd.f32 %v513_v62, %v498_v40  ;;  %v530_v48 = vmul.f32 0.02, %v522_v41  ;;  %v2112_v61 = vld [vmem:[%s3056_s3 + $0x84] ss:$28 sps:$4 sm:$0xff]  }
 0x1b9   : > { %1319 = vmatprep.mubr.bf16.mxu1 %v543_v20  ;;  %1372 = vmatprep.mubr.bf16.mxu0 %v543_v20  ;;  %v2113_v62 = vld [vmem:[%s3056_s3 + $0x248] ss:$28 sps:$4 sm:$0xff]   ;;  %v2139_v25 = vld [vmem:[%s3056_s3 + $0x1a0] ss:$28 sps:$4 sm:$0xff]   ;;  %v2142_v26 = vld [vmem:[%s3056_s3 + $0x1d4] ss:$28 sps:$4 sm:$0xff]  }
 0x1ba   : > { %1320 = vmatmul.mubr.bf16.vlgmr.msra.gmra.mrb[0].mxu1 %v2771_v32  ;;  %1373 = vmatmul.mubr.bf16.vlgmr.msra.gmra.mrb[8].mxu0 %v2771_v32  ;;  %v533_v49 = vmul.f32 0.02, %v525_v45  ;;  %v532_v50 = vmul.f32 0.02, %v524_v47  ;;  %v539_v53 = vmax.f32 %v523_v37, %v531_v46  ;;  %v538_v59 = vmax.f32 %v522_v41, %v530_v48  ;;  %v2145_v29 = vld [vmem:[%s3056_s3 + $0x20c] ss:$28 sps:$4 sm:$0xff]  }
 0x1bb   : > { %1394 = vmatpush1.bf16.msra.mxu1 %v2100_v23  ;;  %1909 = vmatpush3.bf16.msra.mxu0 %v2104_v42  ;;  %v2143_v33 = vld [vmem:[%s3056_s3 + $0x208] ss:$28 sps:$4 sm:$0xff]   ;;  %v2146_v34 = vld [vmem:[%s3056_s3 + $0x240] ss:$28 sps:$4 sm:$0xff]   ;;  %v2149_v27 = vld [vmem:[%s3056_s3 + $0x278] ss:$28 sps:$4 sm:$0xff]  }
 0x1bc   : > { %1395 = vmatprep.subr.bf16.mxu1 %v2107_v43  ;;  %1910 = vmatprep.subr.bf16.mxu0 %v2108_v44  ;;  %v541_v54 = vmax.f32 %v525_v45, %v533_v49  ;;  %v540_v60 = vmax.f32 %v524_v47, %v532_v50  ;;  %v2148_v15 = vld [vmem:[%s3056_s3 + $0x244] ss:$28 sps:$4 sm:$0xff]   ;;  %v2151_v17 = vld [vmem:[%s3056_s3 + $0x27c] ss:$28 sps:$4 sm:$0xff]   ;;  %v2154_v35 = vld [vmem:[%s3056_s3 + $0x2b4] ss:$28 sps:$4 sm:$0xff]  }
 0x1bd   : > { %v2152_v36 = vld [vmem:[%s3056_s3 + $0x2b0] ss:$28 sps:$4 sm:$0xff]   ;;  %v2155_v40 = vld [vmem:[%s3056_s3 + $0x2e8] ss:$28 sps:$4 sm:$0xff]   ;;  %v2163_v23 = vld [vmem:[%s3056_s3 + $0x35c] ss:$28 sps:$4 sm:$0xff]  }
 0x1be   : > { %v2796_v63 = vpack.c.bf16 %v541_v54, %v539_v53  ;;  %v2798_v57 = vpack.c.bf16 %v540_v60, %v538_v59  ;;  %v2157_v37 = vld [vmem:[%s3056_s3 + $0x2ec] ss:$28 sps:$4 sm:$0xff]   ;;  %v2160_v41 = vld [vmem:[%s3056_s3 + $0x324] ss:$28 sps:$4 sm:$0xff]   ;;  %v2161_v42 = vld [vmem:[%s3056_s3 + $0x358] ss:$28 sps:$4 sm:$0xff]  }
 0x1bf   : > { %1396 = vmatpush1.bf16.msra.mxu1 %v2105_v51  ;;  %1911 = vmatpush3.bf16.msra.mxu0 %v2109_v52  ;;  %v2927_v43 = vld [vmem:[%s3057_s4] sm:$0x7f]  ;;  %v690_v44 = vsub.s32 3, %v2575_v55 }
 0x1c0   : > { %1329 = vmatprep.mubr.bf16.mxu1 %v2796_v63  ;;  %1382 = vmatprep.mubr.bf16.mxu0 %v2796_v63  ;;  %v679_v45 = vrot.slane %v2927_v43, %v2578_v56  ;;  %v2934_v46 = vrot.slane %v2927_v43, %v2743_v38 }
 0x1c1   : > { %1397 = vmatprep.subr.bf16.mxu1 %v2112_v61  ;;  %1912 = vmatprep.subr.bf16.mxu0 %v2113_v62  ;;  %v2941_v47 = vrot.slane %v2927_v43, %v690_v44 }
 0x1c2   : > { %1330 = vmatmul.mubr.bf16.gmra.mrb[4].mxu1 %v2798_v57  ;;  %1383 = vmatmul.mubr.bf16.gmra.mrb[12].mxu0 %v2798_v57 }
 0x1c3   : > { %1398 = vmatpush1.bf16.msra.mxu1 %v2110_v0  ;;  %1913 = vmatpush3.bf16.msra.mxu0 %v2114_v2 }
 0x1c4   : > { %1425 = vmatprep.mubr.bf16.mxu1 %v543_v20  ;;  %1478 = vmatprep.mubr.bf16.mxu0 %v543_v20  ;;  %v2158_v20 = vld [vmem:[%s3056_s3 + $0x320] ss:$28 sps:$4 sm:$0xff]  }
 0x1c5   : > { %1399 = vmatprep.subr.bf16.mxu1 %v2117_v1  ;;  %1914 = vmatprep.subr.bf16.mxu0 %v2118_v3 }
 0x1c7   : > { %1400 = vmatpush1.bf16.msra.mxu1 %v2115_v5  ;;  %1915 = vmatpush3.bf16.msra.mxu0 %v2119_v6 }
 0x1c8   : > { %1401 = vmatprep.subr.bf16.mxu1 %v2122_v8  ;;  %1916 = vmatprep.subr.bf16.mxu0 %v2123_v9 }
 0x1cb   : > { %1402 = vmatpush1.bf16.msra.mxu1 %v2120_v10  ;;  %1917 = vmatpush3.bf16.msra.mxu0 %v2124_v11 }
 0x1cc   : > { %1403 = vmatprep.subr.bf16.mxu1 %v2127_v12  ;;  %1918 = vmatprep.subr.bf16.mxu0 %v2128_v13 }
 0x1cf   : > { %1404 = vmatpush1.bf16.msra.mxu1 %v2125_v14  ;;  %1919 = vmatpush3.bf16.msra.mxu0 %v2129_v16 }
 0x1d0   : > { %1405 = vmatprep.subr.bf16.mxu1 %v2132_v18  ;;  %1920 = vmatprep.subr.bf16.mxu0 %v2133_v21 }
 0x1d3   : > { %1406 = vmatpush1.bf16.msra.mxu1 %v2130_v4  ;;  %1921 = vmatpush3.bf16.msra.mxu0 %v2134_v7 }
 0x1d4   : > { %1407 = vmatprep.subr.bf16.mxu1 %v2137_v19  ;;  %1922 = vmatprep.subr.bf16.mxu0 %v2138_v22 }
 0x1d7   : > { %1408 = vmatpush1.bf16.msra.mxu1 %v2135_v24  ;;  %1923 = vmatpush3.bf16.msra.mxu0 %v2139_v25 }
 0x1d8   : > { %1409 = vmatprep.subr.bf16.mxu1 %v2142_v26 }
 0x1da   : > { %1479 = vmatmul.mubr.bf16.vlgmr.msra.gmra.mrb[16].mxu0 %v2771_v32 }
 0x1db   : > { %1410 = vmatpush1.bf16.msra.mxu1 %v2140_v28  ;;  %1486 = vmatprep.mubr.bf16.mxu0 %v2796_v63 }
 0x1dc   : > { %1411 = vmatprep.subr.bf16.mxu1 %v2145_v29 }
 0x1df   : > { %1412 = vmatpush1.bf16.msra.mxu1 %v2143_v33 }
 0x1e0   : > { %1413 = vmatprep.subr.bf16.mxu1 %v2148_v15 }
 0x1e2   : > { %1487 = vmatmul.mubr.bf16.gmra.mrb[20].mxu0 %v2798_v57 }
 0x1e3   : > { %1414 = vmatpush1.bf16.msra.mxu1 %v2146_v34 }
 0x1e4   : > { %1415 = vmatprep.subr.bf16.mxu1 %v2151_v17 }
 0x1e7   : > { %1416 = vmatpush1.bf16.msra.mxu1 %v2149_v27 }
 0x1e8   : > { %1417 = vmatprep.subr.bf16.mxu1 %v2154_v35 }
 0x1eb   : > { %1418 = vmatpush1.bf16.msra.mxu1 %v2152_v36 }
 0x1ec   : > { %1419 = vmatprep.subr.bf16.mxu1 %v2157_v37 }
 0x1ef   : > { %1420 = vmatpush1.bf16.msra.mxu1 %v2155_v40 }
 0x1f0   : > { %1421 = vmatprep.subr.bf16.mxu1 %v2160_v41 }
 0x1f3   : > { %1422 = vmatpush1.bf16.msra.mxu1 %v2158_v20 }
 0x1f4   : > { %1423 = vmatprep.subr.bf16.mxu1 %v2163_v23 }
 0x1f7   : > { %1424 = vmatpush1.bf16.msra.mxu1 %v2161_v42 }
 0x1fa   : > { %1426 = vmatmul.mubr.bf16.vlgmr.msra.gmra.mrb[8].mxu1 %v2771_v32  ;;  %v2938_v32 = vrot.slane %v2927_v43, %v2739_v30 }
 0x1fb   : > { %1435 = vmatprep.mubr.bf16.mxu1 %v2796_v63 }
 0x202   : > { %1436 = vmatmul.mubr.bf16.gmra.mrb[12].mxu1 %v2798_v57 }
 0x28d   : > { %v1321_v48 = vpop.f32.mrb[0].mxu1  ;;  %v1374_v49 = vpop.f32.mrb[8].mxu0 }
 0x28e   : > { %v1322_v50 = vadd.f32 %v1321_v48, %v679_v45  ;;  %v1375_v51 = vadd.f32 %v1374_v49, %v2934_v46  ;;  %v1323_v52 = vpop.f32.mrb[1].mxu1  ;;  %v1376_v53 = vpop.f32.mrb[9].mxu0 }
 0x28f   : > { %v1324_v56 = vadd.f32 %v1323_v52, %v2938_v32  ;;  %v1377_v54 = vadd.f32 %v1376_v53, %v2941_v47  ;;  %v1325_v38 = vpop.f32.mrb[2].mxu1  ;;  %v1378_v59 = vpop.f32.mrb[10].mxu0 }
 0x290   : > { %v1495_v60 = vsub.f32 0.0, %v1322_v50  ;;  %v1497_v61 = vsub.f32 0.0, %v1375_v51  ;;  %v1326_v30 = vadd.f32 %v1325_v38, %v679_v45  ;;  %v1379_v62 = vadd.f32 %v1378_v59, %v2934_v46  ;;  %v1327_v63 = vpop.f32.mrb[3].mxu1  ;;  %v1380_v57 = vpop.f32.mrb[11].mxu0 }
 0x291   : > { %v1496_v0 = vsub.f32 0.0, %v1324_v56  ;;  %v1498_v2 = vsub.f32 0.0, %v1377_v54  ;;  %v1328_v1 = vadd.f32 %v1327_v63, %v2938_v32  ;;  %v1381_v3 = vadd.f32 %v1380_v57, %v2941_v47 }
 0x292   : > { %v1523_v5 = vmul.f32 1.442695, %v1495_v60  ;;  %v1527_v6 = vmul.f32 1.442695, %v1497_v61  ;;  %v1502_v8 = vsub.f32 0.0, %v1326_v30  ;;  %v1504_v9 = vsub.f32 0.0, %v1379_v62 }
 0x293   : > { %v1525_v10 = vmul.f32 1.442695, %v1496_v0  ;;  %v1529_v11 = vmul.f32 1.442695, %v1498_v2  ;;  %v1503_v12 = vsub.f32 0.0, %v1328_v1  ;;  %v1505_v13 = vsub.f32 0.0, %v1381_v3 }
 0x294   : > { %2172 = vpow2.f32 %v1523_v5  ;;  %v1537_v14 = vmul.f32 1.442695, %v1502_v8  ;;  %v1541_v16 = vmul.f32 1.442695, %v1504_v9 }
 0x295   : > { %2174 = vpow2.f32 %v1527_v6  ;;  %v1331_v18 = vpop.f32.mrb[4].mxu1  ;;  %v1384_v21 = vpop.f32.mrb[12].mxu0  ;;  %v1539_v4 = vmul.f32 1.442695, %v1503_v12  ;;  %v1543_v25 = vmul.f32 1.442695, %v1505_v13 }
 0x296   : > { %2176 = vpow2.f32 %v1525_v10  ;;  %v1332_v7 = vadd.f32 %v1331_v18, %v679_v45  ;;  %v1385_v19 = vadd.f32 %v1384_v21, %v2934_v46  ;;  %v1333_v22 = vpop.f32.mrb[5].mxu1  ;;  %v1386_v24 = vpop.f32.mrb[13].mxu0 }
 0x297   : > { %2178 = vpow2.f32 %v1529_v11  ;;  %v1334_v26 = vadd.f32 %v1333_v22, %v2938_v32  ;;  %v1387_v28 = vadd.f32 %v1386_v24, %v2941_v47  ;;  %v1335_v29 = vpop.f32.mrb[6].mxu1  ;;  %v1388_v33 = vpop.f32.mrb[14].mxu0  ;;  %v703_v22 = vrot.slane %v2927_v43, %v506_v39 }
 0x298   : > { %2180 = vpow2.f32 %v1537_v14  ;;  %v1509_v15 = vsub.f32 0.0, %v1332_v7  ;;  %v1511_v34 = vsub.f32 0.0, %v1385_v19  ;;  %v1336_v17 = vadd.f32 %v1335_v29, %v679_v45  ;;  %v1337_v27 = vpop.f32.mrb[7].mxu1  ;;  %v1390_v35 = vpop.f32.mrb[15].mxu0 }
 0x299   : > { %2182 = vpow2.f32 %v1541_v16  ;;  %v1510_v36 = vsub.f32 0.0, %v1334_v26  ;;  %v1512_v37 = vsub.f32 0.0, %v1387_v28  ;;  %v1389_v38 = vadd.f32 %v1388_v33, %v2934_v46 }
 0x29a   : > { %2184 = vpow2.f32 %v1539_v4  ;;  %v1551_v40 = vmul.f32 1.442695, %v1509_v15  ;;  %v1555_v41 = vmul.f32 1.442695, %v1511_v34  ;;  %v1516_v20 = vsub.f32 0.0, %v1336_v17 }
 0x29b   : > { %2186 = vpow2.f32 %v1543_v25  ;;  %v1553_v23 = vmul.f32 1.442695, %v1510_v36  ;;  %v1557_v42 = vmul.f32 1.442695, %v1512_v37  ;;  %v1338_v61 = vadd.f32 %v1337_v27, %v2938_v32 }
 0x29c   : > { %2188 = vpow2.f32 %v1551_v40  ;;  %v1565_v44 = vmul.f32 1.442695, %v1516_v20  ;;  %v1391_v63 = vadd.f32 %v1390_v35, %v2941_v47  ;;  %v1518_v3 = vsub.f32 0.0, %v1389_v38 }
 0x29d   : > { %2190 = vpow2.f32 %v1555_v41  ;;  %v1517_v6 = vsub.f32 0.0, %v1338_v61 }
 0x29e   : > { %v2173_v48 = vpop.eup %2172  ;;  %2192 = vpow2.f32 %v1553_v23  ;;  %v1519_v9 = vsub.f32 0.0, %v1391_v63  ;;  %v1569_v13 = vmul.f32 1.442695, %v1518_v3 }
 0x29f   : > { %v2175_v49 = vpop.eup %2174  ;;  %v1579_v45 = vadd.f32 1.0, %v2173_v48  ;;  %2194 = vpow2.f32 %v1557_v42  ;;  %v1567_v18 = vmul.f32 1.442695, %v1517_v6 }
 0x2a0   : > { %v2177_v50 = vpop.eup %2176  ;;  %v1581_v51 = vadd.f32 1.0, %v2175_v49  ;;  %2196 = vpow2.f32 %v1565_v44  ;;  %v1571_v4 = vmul.f32 1.442695, %v1519_v9 }
 0x2a1   : > { %v2179_v52 = vpop.eup %2178  ;;  %2198 = vrcp.f32 %v1579_v45  ;;  %v1580_v53 = vadd.f32 1.0, %v2177_v50 }
 0x2a2   : > { %v2181_v56 = vpop.eup %2180  ;;  %2200 = vrcp.f32 %v1581_v51  ;;  %v1582_v54 = vadd.f32 1.0, %v2179_v52 }
 0x2a3   : > { %v2183_v59 = vpop.eup %2182  ;;  %2202 = vrcp.f32 %v1580_v53  ;;  %v1586_v60 = vadd.f32 1.0, %v2181_v56 }
 0x2a4   : > { %v2185_v30 = vpop.eup %2184  ;;  %2204 = vrcp.f32 %v1582_v54  ;;  %v1588_v62 = vadd.f32 1.0, %v2183_v59 }
 0x2a5   : > { %v2187_v57 = vpop.eup %2186  ;;  %2206 = vrcp.f32 %v1586_v60  ;;  %v1587_v0 = vadd.f32 1.0, %v2185_v30 }
 0x2a6   : > { %v2189_v2 = vpop.eup %2188  ;;  %2208 = vrcp.f32 %v1588_v62  ;;  %v1589_v1 = vadd.f32 1.0, %v2187_v57 }
 0x2a7   : > { %v2191_v46 = vpop.eup %2190  ;;  %2210 = vrcp.f32 %v1587_v0  ;;  %v1593_v5 = vadd.f32 1.0, %v2189_v2 }
 0x2a8   : > { %v2193_v8 = vpop.eup %2192  ;;  %2212 = vrcp.f32 %v1589_v1  ;;  %v1595_v32 = vadd.f32 1.0, %v2191_v46 }
 0x2a9   : > { %v2195_v10 = vpop.eup %2194  ;;  %2214 = vrcp.f32 %v1593_v5  ;;  %v1594_v47 = vadd.f32 1.0, %v2193_v8 }
 0x2aa   : > { %v2197_v11 = vpop.eup %2196  ;;  %2216 = vrcp.f32 %v1595_v32  ;;  %v1596_v12 = vadd.f32 1.0, %v2195_v10 }
 0x2ab   : > { %v2199_v14 = vpop.eup %2198  ;;  %2218 = vrcp.f32 %v1594_v47  ;;  %v1600_v16 = vadd.f32 1.0, %v2197_v11  ;;  %v695_v47 = vrot.slane %v2927_v43, %v257_v58 }
 0x2ac   : > { %v2201_v21 = vpop.eup %2200  ;;  %1663 = vst [vmem:[%s2958_s16] sm:$0xff] %v2199_v14  ;;  %2220 = vrcp.f32 %v1596_v12  ;;  %v699_v12 = vrot.slane %v2927_v43, %v480_v31 }
 0x2ad   : > { %v2203_v7 = vpop.eup %2202  ;;  %1665 = vst [vmem:[%s2958_s16 + $0x10] sm:$0xff] %v2201_v21  ;;  %2222 = vrcp.f32 %v1600_v16  ;;  %v1924_v19 = vpop.f32.mrb[16].mxu0 }
 0x2ae   : > { %v2205_v24 = vpop.eup %2204  ;;  %1664 = vst [vmem:[%s2958_s16 + $0x8] sm:$0xff] %v2203_v7  ;;  %2224 = vpow2.f32 %v1569_v13  ;;  %v1925_v25 = vpop.f32.mrb[17].mxu0 }
 0x2af   : > { %v2207_v26 = vpop.eup %2206  ;;  %1666 = vst [vmem:[%s2958_s16 + $0x18] sm:$0xff] %v2205_v24  ;;  %2226 = vpow2.f32 %v1567_v18  ;;  %v1926_v28 = vadd.f32 %v1925_v25, %v1924_v19  ;;  %v1927_v29 = vpop.f32.mrb[18].mxu0 }
 0x2b0   : > { %v2209_v33 = vpop.eup %2208  ;;  %1671 = vst [vmem:[%s2958_s16 + $0x38] sm:$0xff] %v2207_v26  ;;  %2228 = vpow2.f32 %v1571_v4  ;;  %v1928_v15 = vpop.f32.mrb[19].mxu0 }
 0x2b1   : > { %v2211_v34 = vpop.eup %2210  ;;  %1673 = vst [vmem:[%s2958_s16 + $0x48] sm:$0xff] %v2209_v33  ;;  %v1481_v39 = vadd.f32 %v1926_v28, %v703_v22  ;;  %v1929_v17 = vadd.f32 %v1928_v15, %v1927_v29 }
 0x2b2   : > { %v2213_v27 = vpop.eup %2212  ;;  %1672 = vst [vmem:[%s2958_s16 + $0x40] sm:$0xff] %v2211_v34 }
 0x2b3   : > { %v2215_v35 = vpop.eup %2214  ;;  %1674 = vst [vmem:[%s2958_s16 + $0x50] sm:$0xff] %v2213_v27  ;;  %v1501_v36 = vsub.f32 0.0, %v1481_v39  ;;  %v1484_v37 = vadd.f32 %v1929_v17, %v703_v22 }
 0x2b4   : > { %v2217_v40 = vpop.eup %2216  ;;  %1678 = vst [vmem:[%s2958_s16 + $0x70] sm:$0xff] %v2215_v35 }
 0x2b5   : > { %v2219_v41 = vpop.eup %2218  ;;  %1680 = vst [vmem:[%s2958_s16 + $0x80] sm:$0xff] %v2217_v40  ;;  %v1535_v20 = vmul.f32 1.442695, %v1501_v36  ;;  %v1508_v23 = vsub.f32 0.0, %v1484_v37  ;;  %v1930_v42 = vpop.f32.mrb[20].mxu0 }
 0x2b6   : > { %v2221_v44 = vpop.eup %2220  ;;  %1679 = vst [vmem:[%s2958_s16 + $0x78] sm:$0xff] %v2219_v41  ;;  %v1931_v48 = vpop.f32.mrb[21].mxu0 }
 0x2b7   : > { %v2223_v49 = vpop.eup %2222  ;;  %1681 = vst [vmem:[%s2958_s16 + $0x88] sm:$0xff] %v2221_v44  ;;  %2230 = vpow2.f32 %v1535_v20  ;;  %v1549_v45 = vmul.f32 1.442695, %v1508_v23  ;;  %v1932_v50 = vadd.f32 %v1931_v48, %v1930_v42  ;;  %v1933_v51 = vpop.f32.mrb[22].mxu0 }
 0x2b8   : > { %v2225_v52 = vpop.eup %2224  ;;  %1685 = vst [vmem:[%s2958_s16 + $0xa8] sm:$0xff] %v2223_v49  ;;  %v1934_v53 = vpop.f32.mrb[23].mxu0 }
 0x2b9   : > { %v2227_v56 = vpop.eup %2226  ;;  %v1602_v54 = vadd.f32 1.0, %v2225_v52  ;;  %2232 = vpow2.f32 %v1549_v45  ;;  %v1489_v38 = vadd.f32 %v1932_v50, %v703_v22  ;;  %v1935_v59 = vadd.f32 %v1934_v53, %v1933_v51 }
 0x2ba   : > { %v2229_v60 = vpop.eup %2228  ;;  %v1601_v61 = vadd.f32 1.0, %v2227_v56 }
 0x2bb   : > { %2234 = vrcp.f32 %v1602_v54  ;;  %v1603_v30 = vadd.f32 1.0, %v2229_v60  ;;  %v1515_v62 = vsub.f32 0.0, %v1489_v38  ;;  %v1492_v63 = vadd.f32 %v1935_v59, %v703_v22 }
 0x2bc   : > { %2236 = vrcp.f32 %v1601_v61 }
 0x2bd   : > { %2238 = vrcp.f32 %v1603_v30  ;;  %v1563_v57 = vmul.f32 1.442695, %v1515_v62  ;;  %v1522_v0 = vsub.f32 0.0, %v1492_v63 }
 0x2bf   : > { %2240 = vpow2.f32 %v1563_v57  ;;  %v1577_v2 = vmul.f32 1.442695, %v1522_v0 }
 0x2c1   : > { %v2231_v1 = vpop.eup %2230  ;;  %2242 = vpow2.f32 %v1577_v2 }
 0x2c2   : > { %v1585_v3 = vadd.f32 1.0, %v2231_v1 }
 0x2c3   : > { %v2233_v46 = vpop.eup %2232 }
 0x2c4   : > { %2244 = vrcp.f32 %v1585_v3  ;;  %v1592_v5 = vadd.f32 1.0, %v2233_v46 }
 0x2c5   : > { %v2235_v6 = vpop.eup %2234 }
 0x2c6   : > { %v2237_v8 = vpop.eup %2236  ;;  %1687 = vst [vmem:[%s2958_s16 + $0xb8] sm:$0xff] %v2235_v6  ;;  %2246 = vrcp.f32 %v1592_v5 }
 0x2c7   : > { %v2239_v32 = vpop.eup %2238  ;;  %1686 = vst [vmem:[%s2958_s16 + $0xb0] sm:$0xff] %v2237_v8 }
 0x2c8   : > { %1688 = vst [vmem:[%s2958_s16 + $0xc0] sm:$0xff] %v2239_v32 }
 0x2c9   : > { %v2241_v9 = vpop.eup %2240 }
 0x2ca   : > { %v1599_v10 = vadd.f32 1.0, %v2241_v9 }
 0x2cb   : > { %v2243_v11 = vpop.eup %2242 }
 0x2cc   : > { %2248 = vrcp.f32 %v1599_v10  ;;  %v1606_v13 = vadd.f32 1.0, %v2243_v11 }
 0x2cd   : > { %v1427_v14 = vpop.f32.mrb[8].mxu1 }
 0x2ce   : > { %v2245_v16 = vpop.eup %2244  ;;  %2250 = vrcp.f32 %v1606_v13  ;;  %v1428_v18 = vadd.f32 %v1427_v14, %v695_v47  ;;  %v1429_v21 = vpop.f32.mrb[9].mxu1 }
 0x2cf   : > { %1670 = vst.msk [vmem:[%s2958_s16 + $0x30] sm:$0xff] %vm1669_vm0, %v2245_v16  ;;  %v1430_v4 = vadd.f32 %v1429_v21, %v699_v12  ;;  %v1431_v7 = vpop.f32.mrb[10].mxu1 }
 0x2d0   : > { %v2247_v19 = vpop.eup %2246  ;;  %v1499_v58 = vsub.f32 0.0, %v1428_v18  ;;  %v1432_v22 = vadd.f32 %v1431_v7, %v695_v47  ;;  %v1433_v24 = vpop.f32.mrb[11].mxu1 }
 0x2d1   : > { %1677 = vst.msk [vmem:[%s2958_s16 + $0x68] sm:$0xff] %vm1669_vm0, %v2247_v19  ;;  %v1500_v55 = vsub.f32 0.0, %v1430_v4  ;;  %v1434_v31 = vadd.f32 %v1433_v24, %v699_v12 }
 0x2d2   : > { %v1531_v43 = vmul.f32 1.442695, %v1499_v58  ;;  %v1506_v25 = vsub.f32 0.0, %v1432_v22 }
 0x2d3   : > { %v1533_v26 = vmul.f32 1.442695, %v1500_v55  ;;  %v1507_v28 = vsub.f32 0.0, %v1434_v31 }
 0x2d4   : > { %2252 = vpow2.f32 %v1531_v43  ;;  %v1545_v29 = vmul.f32 1.442695, %v1506_v25 }
 0x2d5   : > { %2254 = vpow2.f32 %v1533_v26  ;;  %v1547_v33 = vmul.f32 1.442695, %v1507_v28  ;;  %v1437_v15 = vpop.f32.mrb[12].mxu1 }
 0x2d6   : > { %v2249_v34 = vpop.eup %2248  ;;  %2256 = vpow2.f32 %v1545_v29  ;;  %v1438_v39 = vadd.f32 %v1437_v15, %v695_v47  ;;  %v1439_v17 = vpop.f32.mrb[13].mxu1 }
 0x2d7   : > { %1684 = vst.msk [vmem:[%s2958_s16 + $0xa0] sm:$0xff] %vm1669_vm0, %v2249_v34  ;;  %2258 = vpow2.f32 %v1547_v33  ;;  %v1440_v27 = vadd.f32 %v1439_v17, %v699_v12  ;;  %v1441_v35 = vpop.f32.mrb[14].mxu1 }
 0x2d8   : > { %v2251_v36 = vpop.eup %2250  ;;  %v1513_v37 = vsub.f32 0.0, %v1438_v39  ;;  %v1442_v40 = vadd.f32 %v1441_v35, %v695_v47  ;;  %v1443_v41 = vpop.f32.mrb[15].mxu1 }
 0x2d9   : > { %1691 = vst.msk [vmem:[%s2958_s16 + $0xd8] sm:$0xff] %vm1669_vm0, %v2251_v36  ;;  %v1514_v20 = vsub.f32 0.0, %v1440_v27  ;;  %v1444_v23 = vadd.f32 %v1443_v41, %v699_v12 }
 0x2da   : > { %v1559_v42 = vmul.f32 1.442695, %v1513_v37  ;;  %v1520_v44 = vsub.f32 0.0, %v1442_v40 }
 0x2db   : > { %v1561_v48 = vmul.f32 1.442695, %v1514_v20  ;;  %v1521_v49 = vsub.f32 0.0, %v1444_v23 }
 0x2dc   : > { %2260 = vpow2.f32 %v1559_v42  ;;  %v1573_v45 = vmul.f32 1.442695, %v1520_v44 }
 0x2dd   : > { %2262 = vpow2.f32 %v1561_v48  ;;  %v1575_v50 = vmul.f32 1.442695, %v1521_v49 }
 0x2de   : > { %v2253_v51 = vpop.eup %2252  ;;  %2264 = vpow2.f32 %v1573_v45 }
 0x2df   : > { %v2255_v52 = vpop.eup %2254  ;;  %v1583_v53 = vadd.f32 1.0, %v2253_v51  ;;  %2266 = vpow2.f32 %v1575_v50 }
 0x2e0   : > { %v2257_v56 = vpop.eup %2256  ;;  %v1584_v54 = vadd.f32 1.0, %v2255_v52 }
 0x2e1   : > { %v2259_v38 = vpop.eup %2258  ;;  %2268 = vrcp.f32 %v1583_v53  ;;  %v1590_v59 = vadd.f32 1.0, %v2257_v56 }
 0x2e2   : > { %2270 = vrcp.f32 %v1584_v54  ;;  %v1591_v60 = vadd.f32 1.0, %v2259_v38 }
 0x2e3   : > { %2272 = vrcp.f32 %v1590_v59 }
 0x2e4   : > { %2274 = vrcp.f32 %v1591_v60 }
 0x2e6   : > { %v2261_v61 = vpop.eup %2260 }
 0x2e7   : > { %v2263_v30 = vpop.eup %2262  ;;  %v1597_v62 = vadd.f32 1.0, %v2261_v61 }
 0x2e8   : > { %v2265_v63 = vpop.eup %2264  ;;  %v1598_v57 = vadd.f32 1.0, %v2263_v30 }
 0x2e9   : > { %v2267_v0 = vpop.eup %2266  ;;  %2276 = vrcp.f32 %v1597_v62  ;;  %v1604_v2 = vadd.f32 1.0, %v2265_v63 }
 0x2ea   : > { %2278 = vrcp.f32 %v1598_v57  ;;  %v1605_v1 = vadd.f32 1.0, %v2267_v0 }
 0x2eb   : > { %v2269_v3 = vpop.eup %2268  ;;  %2280 = vrcp.f32 %v1604_v2 }
 0x2ec   : > { %v2271_v46 = vpop.eup %2270  ;;  %1667 = vst [vmem:[%s2958_s16 + $0x20] sm:$0xff] %v2269_v3  ;;  %2282 = vrcp.f32 %v1605_v1 }
 0x2ed   : > { %v2273_v5 = vpop.eup %2272  ;;  %1668 = vst [vmem:[%s2958_s16 + $0x28] sm:$0xff] %v2271_v46 }
 0x2ee   : > { %v2275_v6 = vpop.eup %2274  ;;  %1675 = vst [vmem:[%s2958_s16 + $0x58] sm:$0xff] %v2273_v5 }
 0x2ef   : > { %1676 = vst [vmem:[%s2958_s16 + $0x60] sm:$0xff] %v2275_v6 }
 0x2f3   : > { %v2277_v8 = vpop.eup %2276 }
 0x2f4   : > { %v2279_v32 = vpop.eup %2278  ;;  %1682 = vst [vmem:[%s2958_s16 + $0x90] sm:$0xff] %v2277_v8 }
 0x2f5   : > { %v2281_v9 = vpop.eup %2280  ;;  %1683 = vst [vmem:[%s2958_s16 + $0x98] sm:$0xff] %v2279_v32 }
 0x2f6   : > { %v2283_v10 = vpop.eup %2282  ;;  %1689 = vst [vmem:[%s2958_s16 + $0xc8] sm:$0xff] %v2281_v9 }
 0x2f7   : > { %1690 = vst [vmem:[%s2958_s16 + $0xd0] sm:$0xff] %v2283_v10 }
 0x2f8   : > { %2297 = shalt.err (!%p2294_p3)
}
 0x2f9   : > { %s2298_s25 = scalar_lea.hbm %s3006_s6, 3584  ;;  %s2302_s13 = scalar_lea.hbm %s3058_s5, 7168 }
 0x2fa   : > { %p2299_p4 = scmp.ne.s32.totalorder %s3006_s6, %s2298_s25  ;;  %p2303_p9 = scmp.lt.u32.totalorder %s3006_s6, %s3058_s5 }
 0x2fb   : > { %p2304_p10 = scmp.lt.u32.totalorder %s2302_s13, %s2298_s25  ;;  %p2306_p12 = scmp.lt.u32.totalorder %s2298_s25, %s3006_s6 }
 0x2fc   : > { %p2300_p7 = pnand %p2299_p4, %p2420_p5 }
 0x2fd   : > { %p2305_p11 = por %p2304_p10, %p2303_p9 }
 0x2fe   : > { %p2301_p8 = pneg %p2300_p7 }
 0x2ff   : > { %p2307_p13 = por %p2306_p12, %p2305_p11 }
 0x301   : > { %p2308_p0 = pnand %p2307_p13, %p2301_p8 }
 0x303   : > { %2311 = shalt.err (!%p2308_p0)
}
 0x304   : > { %s2350_s16 = smov 896   ;;  %s2351_s17 = smov 56  }
 0x305   : > { %1938 = dma.vmem_to_hbm [thread:$0]  (%p2420_p5), %s3000_s23, 3584, %s3006_s6, %s3012_s22, %s2350_s16, %s2350_s16, %s2351_s17  }
 0x306 PF: > { %p1944_p1 = scmp.ge.s32.totalorder %s2346_s21, 2  ;;  %s1722_s26 = sand.u32 1, %s2334_s18  }
 0x307   : > { %s1723_s30 = scalar_lea.sflag [#allocation3], %s1722_s26 }
 0x308   : > { %p1941_p2 = pnand %p1944_p1, %p2424_p6 }
 0x30a   : > { %2329 = dma.done.wait (!%p1941_p2), %s1723_s30, 3584  }
 0x30b   : > { %2331 = vsyncadd (!%p1941_p2), %s1723_s30, 4294963712  ;;  %p15_p3 = scmp.ge.s32.totalorder %s2407_s24, 4   ;;  %s3061_s18 = smov %s2338_s19 }
 0x30c   : > { %s3062_s19 = smov %s2342_s20  ;;  %s3063_s20 = smov %s2418_s27 }
 0x30d   : > { %s3064_s21 = smov %s2407_s24  ;;  %17 = sbr.rel (!%p15_p3) target bundleno = 3 (0x3), region = 75 }
 0x314   :  { %1728 = vsyncpa [#allocation3], 1 }
 0x315   :  { %1730 = vsyncpa [#allocation3 + $0x1], 1 }

</bundles_post_ra>
